<compile_context>
chip_gen: v6e
topology: v6e:2x2x1
jax: 0.10.0
libtpu: 0.0.40
codegen_flags: <defaults>
</compile_context>

<pallas_src>
import functools

import jax
import jax.numpy as jnp
from jax.experimental import pallas as pl
from jax.experimental.pallas import tpu as pltpu


def _round_up(x, m):
    return ((x + m - 1) // m) * m


def _matmul_bias_act_kernel(a_ref, b_ref, bias_ref, o_ref, acc_ref, *, apply_relu):
    """One (tm, tn) output tile, reduced over the K grid axis (axis 2).

    a_ref    : (tm, tk)  im2col patch tile
    b_ref    : (tk, tn)  folded-weight tile
    bias_ref : (1,  tn)  bias tile (f32)
    o_ref    : (tm, tn)  output tile
    acc_ref  : (tm, tn)  f32 VMEM scratch accumulator (persists across K steps)
    """
    @pl.when(pl.program_id(2) == 0)
    def _():
        acc_ref[...] = jnp.zeros_like(acc_ref)

    acc_ref[...] += jnp.dot(a_ref[...], b_ref[...],
                            preferred_element_type=jnp.float32)

    # Epilogue (bias + ReLU + store) only on the last reduction step.
    @pl.when(pl.program_id(2) == pl.num_programs(2) - 1)
    def _():
        out = acc_ref[...] + bias_ref[...]
        if apply_relu:
            out = jnp.maximum(out, 0.0)
        o_ref[...] = out.astype(o_ref.dtype)


def conv_layer_pallas(x_nchw, weight, bias, *, stride=1, padding=1,
                      dilation=1, is_last=False,
                      compute_dtype=jnp.float32,
                      tile_m=None, tile_k=None, tile_n=None):
    """Equivalent of ConvLayer.forward (Conv2d + optional ReLU).

    x_nchw : (N, Cin, H, W)        float32
    weight : (Cout, Cin, KH, KW)   float32 (PyTorch layout)
    bias   : (Cout,)               float32
    returns: (N, Cout, Hout, Wout) float32
    """
    n, cin, h, w = x_nchw.shape
    cout, cin_w, kh, kw = weight.shape
    assert cin == cin_w

    hout = (h + 2 * padding - dilation * (kh - 1) - 1) // stride + 1
    wout = (w + 2 * padding - dilation * (kw - 1) - 1) // stride + 1

    # ---- im2col in the wrapper (plain-JAX glue, fused by XLA) ----------------
    x_nhwc = jnp.transpose(x_nchw, (0, 2, 3, 1))
    x_pad = jnp.pad(x_nhwc, ((0, 0), (padding, padding), (padding, padding), (0, 0)))
    taps = []
    for ih in range(kh):
        for iw in range(kw):
            h0, w0 = ih * dilation, iw * dilation
            taps.append(jax.lax.slice(
                x_pad,
                (0, h0, w0, 0),
                (n, h0 + (hout - 1) * stride + 1, w0 + (wout - 1) * stride + 1, cin),
                (1, stride, stride, 1)))
    # (N, Hout, Wout, KH*KW*Cin) -> (M, K); tap order (KH, KW, Cin) matches the
    # weight reshape below.
    a = jnp.concatenate(taps, axis=-1).reshape(n * hout * wout, kh * kw * cin)
    # (Cout, Cin, KH, KW) -> (KH, KW, Cin, Cout) -> (K, Cout)
    b = jnp.transpose(weight, (2, 3, 1, 0)).reshape(kh * kw * cin, cout)

    m_dim, k_dim = a.shape

    # ---- tile selection: lane-dense output, MXU-friendly K, VMEM-safe M -----
    if tile_n is None:
        tile_n = min(256, _round_up(cout, 128))   # >=128 lanes -> unmasked vst
    if tile_k is None:
        tile_k = min(512, _round_up(k_dim, 128))  # fill MXU contraction rows
    if tile_m is None:
        tile_m = min(512, _round_up(m_dim, 8))

    m_pad = _round_up(m_dim, tile_m)
    k_pad = _round_up(k_dim, tile_k)
    n_pad = _round_up(cout, tile_n)

    # Zero-padding on K/Cout contributes nothing to the matmul; padded output
    # rows/cols are sliced off below.
    a = jnp.pad(a, ((0, m_pad - m_dim), (0, k_pad - k_dim))).astype(compute_dtype)
    b = jnp.pad(b, ((0, k_pad - k_dim), (0, n_pad - cout))).astype(compute_dtype)
    bias2d = jnp.pad(bias.reshape(1, cout),
                     ((0, 0), (0, n_pad - cout))).astype(jnp.float32)

    grid = (m_pad // tile_m, n_pad // tile_n, k_pad // tile_k)

    kernel = functools.partial(_matmul_bias_act_kernel, apply_relu=not is_last)

    out = pl.pallas_call(
        kernel,
        out_shape=jax.ShapeDtypeStruct((m_pad, n_pad), jnp.float32),
        grid_spec=pltpu.PrefetchScalarGridSpec(
            num_scalar_prefetch=0,
            grid=grid,
            in_specs=[
                pl.BlockSpec((tile_m, tile_k), lambda i, j, k: (i, k)),
                pl.BlockSpec((tile_k, tile_n), lambda i, j, k: (k, j)),
                pl.BlockSpec((1, tile_n), lambda i, j, k: (0, j)),
            ],
            out_specs=pl.BlockSpec((tile_m, tile_n), lambda i, j, k: (i, j)),
            scratch_shapes=[pltpu.VMEM((tile_m, tile_n), jnp.float32)],
        ),
        compiler_params=pltpu.CompilerParams(
            dimension_semantics=("parallel", "parallel", "arbitrary"),
        ),
    )(a, b, bias2d)

    out = out[:m_dim, :cout].reshape(n, hout, wout, cout)
    # NHWC -> NCHW to match the PyTorch output convention.
    return jnp.transpose(out, (0, 3, 1, 2))


if __name__ == "__main__":
    # Small shapes consistent with the module: ConvLayer(4, 8, 3, 1, padding=1)
    N, CIN, H, W = 2, 4, 16, 16
    COUT, K = 8, 3
    STRIDE, PAD, DIL = 1, 1, 1
    IS_LAST = False

    key = jax.random.PRNGKey(0)
    kx, kw_, kb = jax.random.split(key, 3)

    x = jax.random.normal(kx, (N, CIN, H, W), dtype=jnp.float32)
    # Deterministic Conv2d-like init (uniform in +-1/sqrt(fan_in)).
    fan_in = CIN * K * K
    bound = 1.0 / (fan_in ** 0.5)
    weight = jax.random.uniform(kw_, (COUT, CIN, K, K),
                                minval=-bound, maxval=bound, dtype=jnp.float32)
    bias = jax.random.uniform(kb, (COUT,),
                              minval=-bound, maxval=bound, dtype=jnp.float32)

    out = conv_layer_pallas(x, weight, bias, stride=STRIDE, padding=PAD,
                            dilation=DIL, is_last=IS_LAST)
    out = jax.block_until_ready(out)

    # Sanity check against XLA's reference convolution (+ReLU).
    ref = jax.lax.conv_general_dilated(
        x, weight, window_strides=(STRIDE, STRIDE),
        padding=((PAD, PAD), (PAD, PAD)),
        rhs_dilation=(DIL, DIL),
        dimension_numbers=("NCHW", "OIHW", "NCHW"),
    ) + bias.reshape(1, COUT, 1, 1)
    if not IS_LAST:
        ref = jnp.maximum(ref, 0.0)
    assert out.shape == (N, COUT, H, W)
    assert jnp.allclose(out, ref, atol=1e-4, rtol=1e-4)

    print("KERNEL_OK")
</pallas_src>

<mosaic_0001>
module attributes {stable_mosaic.version = 11 : i64} {
  func.func @_matmul_bias_act_kernel(%arg0: i32, %arg1: i32, %arg2: i32, %arg3: memref<512x128xf32, #tpu.memory_space<vmem>>, %arg4: memref<128x128xf32, #tpu.memory_space<vmem>>, %arg5: memref<1x128xf32, #tpu.memory_space<vmem>>, %arg6: memref<512x128xf32, #tpu.memory_space<vmem>>, %arg7: memref<512x128xf32, #tpu.memory_space<vmem>>) attributes {dimension_semantics = [#tpu.dimension_semantics<parallel>, #tpu.dimension_semantics<parallel>, #tpu.dimension_semantics<arbitrary>], iteration_bounds = array<i64: 1, 1, 1>, scalar_prefetch = 0 : i64, scratch_operands = 1 : i64, tpu.core_type = #tpu.core_type<tc>, window_params = [{transform_indices = @transform_0, window_bounds = array<i64: 512, 128>}, {transform_indices = @transform_1, window_bounds = array<i64: 128, 128>}, {transform_indices = @transform_2, window_bounds = array<i64: 1, 128>}, {transform_indices = @transform_3, window_bounds = array<i64: 512, 128>}]} {
    %c0_i32 = arith.constant 0 : i32
    %0 = arith.cmpi eq, %arg2, %c0_i32 : i32
    %1 = arith.extui %0 : i1 to i32
    %c0_i32_0 = arith.constant 0 : i32
    %2 = arith.cmpi ne, %1, %c0_i32_0 : i32
    scf.if %2 {
      %cst_10 = arith.constant 0.000000e+00 : f32
      %12 = vector.broadcast %cst_10 : f32 to vector<512x128xf32>
      %c0_11 = arith.constant 0 : index
      %c0_12 = arith.constant 0 : index
      %13 = vector.load %arg7[%c0_11, %c0_12] : memref<512x128xf32, #tpu.memory_space<vmem>>, vector<512x128xf32>
      tpu.vector_store %arg7[%c0_11, %c0_12], %12 {strides = array<i32>} : memref<512x128xf32, #tpu.memory_space<vmem>>, vector<512x128xf32>,
    } else {
    }
    %c0 = arith.constant 0 : index
    %c0_1 = arith.constant 0 : index
    %3 = vector.load %arg7[%c0, %c0_1] : memref<512x128xf32, #tpu.memory_space<vmem>>, vector<512x128xf32>
    %c0_2 = arith.constant 0 : index
    %c0_3 = arith.constant 0 : index
    %4 = vector.load %arg3[%c0_2, %c0_3] : memref<512x128xf32, #tpu.memory_space<vmem>>, vector<512x128xf32>
    %c0_4 = arith.constant 0 : index
    %c0_5 = arith.constant 0 : index
    %5 = vector.load %arg4[%c0_4, %c0_5] : memref<128x128xf32, #tpu.memory_space<vmem>>, vector<128x128xf32>
    %cst = arith.constant dense<0.000000e+00> : vector<512x128xf32>
    %6 = tpu.matmul %4, %5, %cst {dimension_numbers = #tpu.dot_dimension_numbers<[1], [0], [0], [1], [0, 0, 1, 1], [], []>} : vector<512x128xf32>, vector<128x128xf32>, vector<512x128xf32> -> vector<512x128xf32>
    %7 = arith.addf %3, %6 : vector<512x128xf32>
    %c0_6 = arith.constant 0 : index
    %c0_7 = arith.constant 0 : index
    %8 = vector.load %arg7[%c0_6, %c0_7] : memref<512x128xf32, #tpu.memory_space<vmem>>, vector<512x128xf32>
    tpu.vector_store %arg7[%c0_6, %c0_7], %7 {strides = array<i32>} : memref<512x128xf32, #tpu.memory_space<vmem>>, vector<512x128xf32>,
    %c0_i32_8 = arith.constant 0 : i32
    %9 = arith.cmpi eq, %arg2, %c0_i32_8 : i32
    %10 = arith.extui %9 : i1 to i32
    %c0_i32_9 = arith.constant 0 : i32
    %11 = arith.cmpi ne, %10, %c0_i32_9 : i32
    scf.if %11 {
      %c0_10 = arith.constant 0 : index
      %c0_11 = arith.constant 0 : index
      %12 = vector.load %arg7[%c0_10, %c0_11] : memref<512x128xf32, #tpu.memory_space<vmem>>, vector<512x128xf32>
      %c0_12 = arith.constant 0 : index
      %c0_13 = arith.constant 0 : index
      %13 = vector.load %arg5[%c0_12, %c0_13] : memref<1x128xf32, #tpu.memory_space<vmem>>, vector<1x128xf32>
      %14 = vector.broadcast %13 : vector<1x128xf32> to vector<512x128xf32>
      %15 = arith.addf %12, %14 : vector<512x128xf32>
      %cst_14 = arith.constant 0.000000e+00 : f32
      %16 = vector.broadcast %cst_14 : f32 to vector<512x128xf32>
      %17 = arith.maximumf %15, %16 : vector<512x128xf32>
      %c0_15 = arith.constant 0 : index
      %c0_16 = arith.constant 0 : index
      %18 = vector.load %arg6[%c0_15, %c0_16] : memref<512x128xf32, #tpu.memory_space<vmem>>, vector<512x128xf32>
      tpu.vector_store %arg6[%c0_15, %c0_16], %17 {strides = array<i32>} : memref<512x128xf32, #tpu.memory_space<vmem>>, vector<512x128xf32>,
    } else {
    }
    return
  }
  func.func @transform_0(%arg0: i32, %arg1: i32, %arg2: i32) -> (i32, i32) {
    %c0_i32 = arith.constant 0 : i32
    return %arg0, %arg2 : i32, i32
  }
  func.func @transform_1(%arg0: i32, %arg1: i32, %arg2: i32) -> (i32, i32) {
    %c0_i32 = arith.constant 0 : i32
    return %arg2, %arg1 : i32, i32
  }
  func.func @transform_2(%arg0: i32, %arg1: i32, %arg2: i32) -> (i32, i32) {
    %c0_i32 = arith.constant 0 : i32
    %c0_i32_0 = arith.constant 0 : i32
    return %c0_i32, %arg1 : i32, i32
  }
  func.func @transform_3(%arg0: i32, %arg1: i32, %arg2: i32) -> (i32, i32) {
    %c0_i32 = arith.constant 0 : i32
    return %arg0, %arg1 : i32, i32
  }
}

</mosaic_0001>

<bundles_post_ra>
// kernel: tpu_custom_call.1
= control target key start
LH: loop header
LB: loop body
LE: loop exit
PB: predicated region body
PF: predicated region fallthrough
CT: control target
= control target key end

     0   :  { %8 = vsyncpa [#allocation4], 0  ;;  %s1476_s0 = inlined_call_operand.hbm [shape: f32[512,128], index: 0, kind: input, shape index: {}]   ;;  %s1477_s1 = inlined_call_operand.hbm [shape: f32[128,128], index: 1, kind: input, shape index: {}]   ;;  %s1478_s2 = inlined_call_operand.vmem [shape: f32[1,128], index: 2, kind: input, shape index: {}]   ;;  %s1479_s3 = inlined_call_operand.hbm [shape: f32[512,128], index: 3, kind: output, shape index: {}]  }
   0x1   :  { %9 = vsyncpa [#allocation7], 0 }
   0x2   :  { %10 = vsyncpa [#allocation5], 0  ;;  %s1364_s12 = smov [#allocation3]  }
   0x3   :  { %s16_s13 = sshll.u32 %s1364_s12, 4  ;;  %s17_s13 = int_to_ptr.vmem [resolvable:$true] %s16_s13 }
   0x4   :  { %s1306_s14 = scalar_lea.vmem %s17_s13, 8192  ;;  %p1311_p1 = scmp.lt.s32.totalorder %s17_s13, %s17_s13 }
   0x5   :  { %p1307_p0 = scmp.ne.s32.totalorder %s17_s13, %s1306_s14  ;;  %p1312_p2 = scmp.lt.s32.totalorder %s1306_s14, %s1306_s14 }
   0x7   :  { %p1313_p3 = por %p1312_p2, %p1311_p1 }
   0x9   :  { %p1314_p4 = pnand %p1313_p3, %p1307_p0 }
   0xb   :  { %1317 = shalt.err (!%p1314_p4)
}
   0xc   :  { %s1365_s15 = smov 128   ;;  %s1366_s16 = smov 8  }
   0xd   :  { %22 = dma.hbm_to_vmem [thread:$0]  %s1476_s0, 8192, %s17_s13, [#allocation4], %s1365_s15, %s1365_s15, %s1366_s16  }
   0xe   :  { %s1367_s19 = smov [#allocation6]  }
   0xf   :  { %s28_s20 = sshll.u32 %s1367_s19, 4  ;;  %s29_s20 = int_to_ptr.vmem [resolvable:$true] %s28_s20 }
  0x10   :  { %s1326_s21 = scalar_lea.vmem %s29_s20, 2048  ;;  %p1331_p6 = scmp.lt.s32.totalorder %s29_s20, %s29_s20 }
  0x11   :  { %p1327_p5 = scmp.ne.s32.totalorder %s29_s20, %s1326_s21  ;;  %p1332_p7 = scmp.lt.s32.totalorder %s1326_s21, %s1326_s21 }
  0x13   :  { %p1333_p8 = por %p1332_p7, %p1331_p6 }
  0x15   :  { %p1334_p9 = pnand %p1333_p8, %p1327_p5 }
  0x17   :  { %1337 = shalt.err (!%p1334_p9)
}
  0x18   :  { %34 = dma.hbm_to_vmem [thread:$0]  %s1477_s1, 2048, %s29_s20, [#allocation7], %s1365_s15, %s1365_s15, %s1366_s16  }
  0x19   :  { %1358 = dma.done.wait [#allocation4], 8192  }
  0x1a   :  { %1359 = vsyncadd [#allocation4], 4294959104 }
  0x1b   :  { %1360 = dma.done.wait [#allocation7], 2048  }
  0x1c   :  { %1361 = vsyncadd [#allocation7], 4294965248  ;;  %v254_v0 = vld [vmem:[#allocation6 + $0x78] sm:$0xff]  ;;  %v253_v1 = vld [vmem:[#allocation6 + $0x70] sm:$0xff] }
  0x1d   :  { %1133 = vmatprep.subr.mxu0 %v254_v0  ;;  %1261 = vmatprep.subr.mxu1 %v254_v0  ;;  %v252_v2 = vld [vmem:[#allocation6 + $0x68] sm:$0xff]  ;;  %v251_v3 = vld [vmem:[#allocation6 + $0x60] sm:$0xff]  ;;  %v250_v4 = vld [vmem:[#allocation6 + $0x58] sm:$0xff] }
  0x1e   :  { %1134 = vmatpush3.msra.mxu0 %v254_v0  ;;  %1277 = vmatpush3.msra.mxu1 %v254_v0  ;;  %v249_v5 = vld [vmem:[#allocation6 + $0x50] sm:$0xff]  ;;  %v248_v6 = vld [vmem:[#allocation6 + $0x48] sm:$0xff]  ;;  %v247_v7 = vld [vmem:[#allocation6 + $0x40] sm:$0xff] }
  0x1f   :  { %1135 = vmatprep.subr.mxu0 %v253_v1  ;;  %1262 = vmatprep.subr.mxu1 %v253_v1  ;;  %v246_v8 = vld [vmem:[#allocation6 + $0x38] sm:$0xff]  ;;  %v245_v9 = vld [vmem:[#allocation6 + $0x30] sm:$0xff]  ;;  %v244_v10 = vld [vmem:[#allocation6 + $0x28] sm:$0xff] }
  0x20   :  { %1136 = vmatpush3.msra.mxu0 %v253_v1  ;;  %1278 = vmatpush3.msra.mxu1 %v253_v1  ;;  %v243_v11 = vld [vmem:[#allocation6 + $0x20] sm:$0xff]  ;;  %v242_v12 = vld [vmem:[#allocation6 + $0x18] sm:$0xff]  ;;  %v241_v13 = vld [vmem:[#allocation6 + $0x10] sm:$0xff] }
  0x21   :  { %1137 = vmatprep.subr.mxu0 %v252_v2  ;;  %1263 = vmatprep.subr.mxu1 %v252_v2  ;;  %v240_v14 = vld [vmem:[#allocation6 + $0x8] sm:$0xff]  ;;  %v239_v15 = vld [vmem:[#allocation6] sm:$0xff]  ;;  %v177_v20 = vld [vmem:[#allocation3 + $0x10] sm:$0xff] }
  0x22   :  { %1138 = vmatpush3.msra.mxu0 %v252_v2  ;;  %1279 = vmatpush3.msra.mxu1 %v252_v2  ;;  %v175_v16 = vld [vmem:[#allocation3] sm:$0xff]  ;;  %v176_v18 = vld [vmem:[#allocation3 + $0x8] sm:$0xff]  ;;  %v209_v21 = vld [vmem:[#allocation3 + $0x110] sm:$0xff] }
  0x23   :  { %1139 = vmatprep.subr.mxu0 %v251_v3  ;;  %1264 = vmatprep.subr.mxu1 %v251_v3  ;;  %v207_v17 = vld [vmem:[#allocation3 + $0x100] sm:$0xff]  ;;  %v208_v19 = vld [vmem:[#allocation3 + $0x108] sm:$0xff]  ;;  %v178_v22 = vld [vmem:[#allocation3 + $0x18] sm:$0xff] }
  0x24   :  { %1140 = vmatpush3.msra.mxu0 %v251_v3  ;;  %1280 = vmatpush3.msra.mxu1 %v251_v3  ;;  %v210_v23 = vld [vmem:[#allocation3 + $0x118] sm:$0xff]  ;;  %v179_v24 = vld [vmem:[#allocation3 + $0x20] sm:$0xff]  ;;  %v180_v26 = vld [vmem:[#allocation3 + $0x28] sm:$0xff] }
  0x25   :  { %1141 = vmatprep.subr.mxu0 %v250_v4  ;;  %1265 = vmatprep.subr.mxu1 %v250_v4  ;;  %v211_v25 = vld [vmem:[#allocation3 + $0x120] sm:$0xff]  ;;  %v212_v27 = vld [vmem:[#allocation3 + $0x128] sm:$0xff]  ;;  %v181_v28 = vld [vmem:[#allocation3 + $0x30] sm:$0xff] }
  0x26   :  { %1142 = vmatpush3.msra.mxu0 %v250_v4  ;;  %1281 = vmatpush3.msra.mxu1 %v250_v4  ;;  %v213_v29 = vld [vmem:[#allocation3 + $0x130] sm:$0xff]  ;;  %v182_v30 = vld [vmem:[#allocation3 + $0x38] sm:$0xff]  ;;  %v183_v32 = vld [vmem:[#allocation3 + $0x40] sm:$0xff] }
  0x27   :  { %1143 = vmatprep.subr.mxu0 %v249_v5  ;;  %1266 = vmatprep.subr.mxu1 %v249_v5  ;;  %v214_v31 = vld [vmem:[#allocation3 + $0x138] sm:$0xff]  ;;  %v215_v33 = vld [vmem:[#allocation3 + $0x140] sm:$0xff]  ;;  %v184_v34 = vld [vmem:[#allocation3 + $0x48] sm:$0xff] }
  0x28   :  { %1144 = vmatpush3.msra.mxu0 %v249_v5  ;;  %1282 = vmatpush3.msra.mxu1 %v249_v5  ;;  %v216_v35 = vld [vmem:[#allocation3 + $0x148] sm:$0xff]  ;;  %v185_v36 = vld [vmem:[#allocation3 + $0x50] sm:$0xff]  ;;  %v186_v38 = vld [vmem:[#allocation3 + $0x58] sm:$0xff] }
  0x29   :  { %1145 = vmatprep.subr.mxu0 %v248_v6  ;;  %1267 = vmatprep.subr.mxu1 %v248_v6  ;;  %v217_v37 = vld [vmem:[#allocation3 + $0x150] sm:$0xff]  ;;  %v218_v39 = vld [vmem:[#allocation3 + $0x158] sm:$0xff]  ;;  %v187_v40 = vld [vmem:[#allocation3 + $0x60] sm:$0xff] }
  0x2a   :  { %1146 = vmatpush3.msra.mxu0 %v248_v6  ;;  %1283 = vmatpush3.msra.mxu1 %v248_v6  ;;  %v219_v41 = vld [vmem:[#allocation3 + $0x160] sm:$0xff]  ;;  %v188_v42 = vld [vmem:[#allocation3 + $0x68] sm:$0xff]  ;;  %v189_v44 = vld [vmem:[#allocation3 + $0x70] sm:$0xff] }
  0x2b   :  { %1147 = vmatprep.subr.mxu0 %v247_v7  ;;  %1268 = vmatprep.subr.mxu1 %v247_v7  ;;  %v220_v43 = vld [vmem:[#allocation3 + $0x168] sm:$0xff]  ;;  %v221_v45 = vld [vmem:[#allocation3 + $0x170] sm:$0xff]  ;;  %v190_v46 = vld [vmem:[#allocation3 + $0x78] sm:$0xff] }
  0x2c   :  { %1148 = vmatpush3.msra.mxu0 %v247_v7  ;;  %1284 = vmatpush3.msra.mxu1 %v247_v7  ;;  %v222_v47 = vld [vmem:[#allocation3 + $0x178] sm:$0xff]  ;;  %v191_v48 = vld [vmem:[#allocation3 + $0x80] sm:$0xff]  ;;  %v192_v50 = vld [vmem:[#allocation3 + $0x88] sm:$0xff] }
  0x2d   :  { %1149 = vmatprep.subr.mxu0 %v246_v8  ;;  %1269 = vmatprep.subr.mxu1 %v246_v8  ;;  %v223_v49 = vld [vmem:[#allocation3 + $0x180] sm:$0xff]  ;;  %v224_v51 = vld [vmem:[#allocation3 + $0x188] sm:$0xff]  ;;  %v193_v52 = vld [vmem:[#allocation3 + $0x90] sm:$0xff] }
  0x2e   :  { %1150 = vmatpush3.msra.mxu0 %v246_v8  ;;  %1285 = vmatpush3.msra.mxu1 %v246_v8  ;;  %v225_v53 = vld [vmem:[#allocation3 + $0x190] sm:$0xff]  ;;  %v194_v54 = vld [vmem:[#allocation3 + $0x98] sm:$0xff]  ;;  %v195_v56 = vld [vmem:[#allocation3 + $0xa0] sm:$0xff] }
  0x2f   :  { %1151 = vmatprep.subr.mxu0 %v245_v9  ;;  %1270 = vmatprep.subr.mxu1 %v245_v9  ;;  %v226_v55 = vld [vmem:[#allocation3 + $0x198] sm:$0xff]  ;;  %v227_v57 = vld [vmem:[#allocation3 + $0x1a0] sm:$0xff]  ;;  %v196_v58 = vld [vmem:[#allocation3 + $0xa8] sm:$0xff] }
  0x30   :  { %1152 = vmatpush3.msra.mxu0 %v245_v9  ;;  %1286 = vmatpush3.msra.mxu1 %v245_v9  ;;  %v228_v59 = vld [vmem:[#allocation3 + $0x1a8] sm:$0xff]  ;;  %v197_v60 = vld [vmem:[#allocation3 + $0xb0] sm:$0xff]  ;;  %v198_v62 = vld [vmem:[#allocation3 + $0xb8] sm:$0xff] }
  0x31   :  { %1153 = vmatprep.subr.mxu0 %v244_v10  ;;  %1271 = vmatprep.subr.mxu1 %v244_v10  ;;  %v229_v61 = vld [vmem:[#allocation3 + $0x1b0] sm:$0xff]  ;;  %v230_v63 = vld [vmem:[#allocation3 + $0x1b8] sm:$0xff]  ;;  %v199_v0 = vld [vmem:[#allocation3 + $0xc0] sm:$0xff] }
  0x32   :  { %1154 = vmatpush3.msra.mxu0 %v244_v10  ;;  %1287 = vmatpush3.msra.mxu1 %v244_v10  ;;  %v231_v1 = vld [vmem:[#allocation3 + $0x1c0] sm:$0xff]  ;;  %v200_v2 = vld [vmem:[#allocation3 + $0xc8] sm:$0xff]  ;;  %v201_v4 = vld [vmem:[#allocation3 + $0xd0] sm:$0xff] }
  0x33   :  { %1155 = vmatprep.subr.mxu0 %v243_v11  ;;  %1272 = vmatprep.subr.mxu1 %v243_v11  ;;  %v232_v3 = vld [vmem:[#allocation3 + $0x1c8] sm:$0xff]  ;;  %v233_v5 = vld [vmem:[#allocation3 + $0x1d0] sm:$0xff]  ;;  %v202_v6 = vld [vmem:[#allocation3 + $0xd8] sm:$0xff] }
  0x34   :  { %1156 = vmatpush3.msra.mxu0 %v243_v11  ;;  %1288 = vmatpush3.msra.mxu1 %v243_v11  ;;  %v234_v7 = vld [vmem:[#allocation3 + $0x1d8] sm:$0xff]  ;;  %v203_v8 = vld [vmem:[#allocation3 + $0xe0] sm:$0xff]  ;;  %v204_v10 = vld [vmem:[#allocation3 + $0xe8] sm:$0xff] }
  0x35   :  { %1157 = vmatprep.subr.mxu0 %v242_v12  ;;  %1273 = vmatprep.subr.mxu1 %v242_v12  ;;  %v235_v9 = vld [vmem:[#allocation3 + $0x1e0] sm:$0xff]  ;;  %v236_v11 = vld [vmem:[#allocation3 + $0x1e8] sm:$0xff] }
  0x36   :  { %1158 = vmatpush3.msra.mxu0 %v242_v12  ;;  %1289 = vmatpush3.msra.mxu1 %v242_v12  ;;  %v205_v12 = vld [vmem:[#allocation3 + $0xf0] sm:$0xff] }
  0x37   :  { %1159 = vmatprep.subr.mxu0 %v241_v13  ;;  %1274 = vmatprep.subr.mxu1 %v241_v13 }
  0x38   :  { %1160 = vmatpush3.msra.mxu0 %v241_v13  ;;  %1290 = vmatpush3.msra.mxu1 %v241_v13  ;;  %v237_v13 = vld [vmem:[#allocation3 + $0x1f0] sm:$0xff] }
  0x39   :  { %1161 = vmatprep.subr.mxu0 %v240_v14  ;;  %1275 = vmatprep.subr.mxu1 %v240_v14 }
  0x3a   :  { %1162 = vmatpush3.msra.mxu0 %v240_v14  ;;  %1291 = vmatpush3.msra.mxu1 %v240_v14  ;;  %v206_v14 = vld [vmem:[#allocation3 + $0xf8] sm:$0xff] }
  0x3b   :  { %1163 = vmatprep.subr.mxu0 %v239_v15  ;;  %1276 = vmatprep.subr.mxu1 %v239_v15 }
  0x3c   :  { %1164 = vmatpush3.msra.mxu0 %v239_v15  ;;  %1292 = vmatpush3.msra.mxu1 %v239_v15  ;;  %v238_v15 = vld [vmem:[#allocation3 + $0x1f8] sm:$0xff] }
  0x3d   :  { %1165 = vmatprep.mubr.f32.mxu0 %v175_v16  ;;  %1213 = vmatprep.mubr.f32.mxu1 %v207_v17  ;;  %v1404_v16 = vld [vmem:[%s1478_s2] ss:$0 sm:$0xff]  ;;  %s1368_s2 = smov [#allocation8]  }
  0x3e   :  { %1166 = vmatmul.mubr.f32.vlgmr.msra.gmra.mxu0 %v176_v18  ;;  %1214 = vmatmul.mubr.f32.vlgmr.msra.gmra.mxu1 %v208_v19  ;;  %s1039_s24 = sshll.u32 %s1368_s2, 4  ;;  %s1040_s24 = int_to_ptr.vmem [resolvable:$true] %s1039_s24 }
  0x3f   :  { %1168 = vmatprep.mubr.f32.mxu0 %v177_v20  ;;  %1216 = vmatprep.mubr.f32.mxu1 %v209_v21  ;;  %s1338_s25 = scalar_lea.vmem %s1040_s24, 8192  ;;  %p1343_p11 = scmp.lt.s32.totalorder %s1040_s24, %s1040_s24 }
  0x40   :  { %p1339_p10 = scmp.ne.s32.totalorder %s1040_s24, %s1338_s25  ;;  %p1344_p12 = scmp.lt.s32.totalorder %s1338_s25, %s1338_s25 }
  0x42   :  { %1169 = vmatmul.mubr.f32.gmra.mxu0 %v178_v22  ;;  %1217 = vmatmul.mubr.f32.gmra.mxu1 %v210_v23  ;;  %p1345_p13 = por %p1344_p12, %p1343_p11 }
  0x43   :  { %1171 = vmatprep.mubr.f32.mxu0 %v179_v24  ;;  %1219 = vmatprep.mubr.f32.mxu1 %v211_v25 }
  0x44   :  { %p1346_p0 = pnand %p1345_p13, %p1339_p10 }
  0x46   :  { %1172 = vmatmul.mubr.f32.gmra.mxu0 %v180_v26  ;;  %1220 = vmatmul.mubr.f32.gmra.mxu1 %v212_v27 }
  0x47   :  { %1174 = vmatprep.mubr.f32.mxu0 %v181_v28  ;;  %1222 = vmatprep.mubr.f32.mxu1 %v213_v29 }
  0x4a   :  { %1175 = vmatmul.mubr.f32.gmra.mxu0 %v182_v30  ;;  %1223 = vmatmul.mubr.f32.gmra.mxu1 %v214_v31 }
  0x4b   :  { %1177 = vmatprep.mubr.f32.mxu0 %v183_v32  ;;  %1225 = vmatprep.mubr.f32.mxu1 %v215_v33 }
  0x4e   :  { %1178 = vmatmul.mubr.f32.gmra.mxu0 %v184_v34  ;;  %1226 = vmatmul.mubr.f32.gmra.mxu1 %v216_v35 }
  0x4f   :  { %1180 = vmatprep.mubr.f32.mxu0 %v185_v36  ;;  %1228 = vmatprep.mubr.f32.mxu1 %v217_v37 }
  0x52   :  { %1181 = vmatmul.mubr.f32.gmra.mxu0 %v186_v38  ;;  %1229 = vmatmul.mubr.f32.gmra.mxu1 %v218_v39 }
  0x53   :  { %1183 = vmatprep.mubr.f32.mxu0 %v187_v40  ;;  %1231 = vmatprep.mubr.f32.mxu1 %v219_v41 }
  0x56   :  { %1184 = vmatmul.mubr.f32.gmra.mxu0 %v188_v42  ;;  %1232 = vmatmul.mubr.f32.gmra.mxu1 %v220_v43 }
  0x57   :  { %1186 = vmatprep.mubr.f32.mxu0 %v189_v44  ;;  %1234 = vmatprep.mubr.f32.mxu1 %v221_v45 }
  0x5a   :  { %1187 = vmatmul.mubr.f32.gmra.mxu0 %v190_v46  ;;  %1235 = vmatmul.mubr.f32.gmra.mxu1 %v222_v47 }
  0x5b   :  { %1189 = vmatprep.mubr.f32.mxu0 %v191_v48  ;;  %1237 = vmatprep.mubr.f32.mxu1 %v223_v49 }
  0x5e   :  { %1190 = vmatmul.mubr.f32.gmra.mxu0 %v192_v50  ;;  %1238 = vmatmul.mubr.f32.gmra.mxu1 %v224_v51 }
  0x5f   :  { %1192 = vmatprep.mubr.f32.mxu0 %v193_v52  ;;  %1240 = vmatprep.mubr.f32.mxu1 %v225_v53 }
  0x62   :  { %1193 = vmatmul.mubr.f32.gmra.mxu0 %v194_v54  ;;  %1241 = vmatmul.mubr.f32.gmra.mxu1 %v226_v55 }
  0x63   :  { %1195 = vmatprep.mubr.f32.mxu0 %v195_v56  ;;  %1243 = vmatprep.mubr.f32.mxu1 %v227_v57 }
  0x66   :  { %1196 = vmatmul.mubr.f32.gmra.mxu0 %v196_v58  ;;  %1244 = vmatmul.mubr.f32.gmra.mxu1 %v228_v59 }
  0x67   :  { %1198 = vmatprep.mubr.f32.mxu0 %v197_v60  ;;  %1246 = vmatprep.mubr.f32.mxu1 %v229_v61 }
  0x6a   :  { %1199 = vmatmul.mubr.f32.gmra.mxu0 %v198_v62  ;;  %1247 = vmatmul.mubr.f32.gmra.mxu1 %v230_v63 }
  0x6b   :  { %1201 = vmatprep.mubr.f32.mxu0 %v199_v0  ;;  %1249 = vmatprep.mubr.f32.mxu1 %v231_v1 }
  0x6e   :  { %1202 = vmatmul.mubr.f32.gmra.mxu0 %v200_v2  ;;  %1250 = vmatmul.mubr.f32.gmra.mxu1 %v232_v3 }
  0x6f   :  { %1204 = vmatprep.mubr.f32.mxu0 %v201_v4  ;;  %1252 = vmatprep.mubr.f32.mxu1 %v233_v5 }
  0x72   :  { %1205 = vmatmul.mubr.f32.gmra.mxu0 %v202_v6  ;;  %1253 = vmatmul.mubr.f32.gmra.mxu1 %v234_v7 }
  0x73   :  { %1207 = vmatprep.mubr.f32.mxu0 %v203_v8  ;;  %1255 = vmatprep.mubr.f32.mxu1 %v235_v9 }
  0x76   :  { %1208 = vmatmul.mubr.f32.gmra.mxu0 %v204_v10  ;;  %1256 = vmatmul.mubr.f32.gmra.mxu1 %v236_v11 }
  0x77   :  { %1210 = vmatprep.mubr.f32.mxu0 %v205_v12  ;;  %1258 = vmatprep.mubr.f32.mxu1 %v237_v13 }
  0x7a   :  { %1211 = vmatmul.mubr.f32.gmra.mxu0 %v206_v14  ;;  %1259 = vmatmul.mubr.f32.gmra.mxu1 %v238_v15 }
  0xfe   :  { %v1167_v17 = vpop.f32.mrf.mxu0  ;;  %v1215_v18 = vpop.f32.mrf.mxu1 }
  0xff   :  { %v843_v19 = vadd.f32 %v1167_v17, %v1404_v16  ;;  %v875_v20 = vadd.f32 %v1215_v18, %v1404_v16 }
 0x100   :  { %v321_v21 = vpop.f32.mrf.mxu0  ;;  %v481_v22 = vpop.f32.mrf.mxu1 }
 0x101   :  { %v907_v23 = vmax.f32 %v843_v19, 0.0  ;;  %v939_v24 = vmax.f32 %v875_v20, 0.0  ;;  %v842_v25 = vadd.f32 %v1404_v16, %v321_v21  ;;  %v874_v26 = vadd.f32 %v1404_v16, %v481_v22 }
 0x102   :  { %v1170_v27 = vpop.f32.mrf.mxu0  ;;  %v1218_v28 = vpop.f32.mrf.mxu1 }
 0x103   :  { %971 = vst [vmem:[#allocation8 + $0x8] sm:$0xff] %v907_v23  ;;  %1003 = vst [vmem:[#allocation8 + $0x108] sm:$0xff] %v939_v24  ;;  %v906_v29 = vmax.f32 %v842_v25, 0.0  ;;  %v938_v30 = vmax.f32 %v874_v26, 0.0  ;;  %v845_v31 = vadd.f32 %v1170_v27, %v1404_v16  ;;  %v877_v32 = vadd.f32 %v1218_v28, %v1404_v16 }
 0x104   :  { %v331_v33 = vpop.f32.mrf.mxu0  ;;  %v491_v34 = vpop.f32.mrf.mxu1 }
 0x105   :  { %970 = vst [vmem:[#allocation8] sm:$0xff] %v906_v29  ;;  %1002 = vst [vmem:[#allocation8 + $0x100] sm:$0xff] %v938_v30  ;;  %v909_v35 = vmax.f32 %v845_v31, 0.0  ;;  %v941_v36 = vmax.f32 %v877_v32, 0.0  ;;  %v844_v37 = vadd.f32 %v1404_v16, %v331_v33  ;;  %v876_v38 = vadd.f32 %v1404_v16, %v491_v34 }
 0x106   :  { %v1173_v39 = vpop.f32.mrf.mxu0  ;;  %v1221_v40 = vpop.f32.mrf.mxu1 }
 0x107   :  { %973 = vst [vmem:[#allocation8 + $0x18] sm:$0xff] %v909_v35  ;;  %1005 = vst [vmem:[#allocation8 + $0x118] sm:$0xff] %v941_v36  ;;  %v908_v41 = vmax.f32 %v844_v37, 0.0  ;;  %v940_v42 = vmax.f32 %v876_v38, 0.0  ;;  %v847_v43 = vadd.f32 %v1173_v39, %v1404_v16  ;;  %v879_v44 = vadd.f32 %v1221_v40, %v1404_v16 }
 0x108   :  { %v341_v45 = vpop.f32.mrf.mxu0  ;;  %v501_v46 = vpop.f32.mrf.mxu1 }
 0x109   :  { %972 = vst [vmem:[#allocation8 + $0x10] sm:$0xff] %v908_v41  ;;  %1004 = vst [vmem:[#allocation8 + $0x110] sm:$0xff] %v940_v42  ;;  %v911_v47 = vmax.f32 %v847_v43, 0.0  ;;  %v943_v48 = vmax.f32 %v879_v44, 0.0  ;;  %v846_v49 = vadd.f32 %v1404_v16, %v341_v45  ;;  %v878_v50 = vadd.f32 %v1404_v16, %v501_v46 }
 0x10a   :  { %v1176_v51 = vpop.f32.mrf.mxu0  ;;  %v1224_v52 = vpop.f32.mrf.mxu1 }
 0x10b   :  { %975 = vst [vmem:[#allocation8 + $0x28] sm:$0xff] %v911_v47  ;;  %1007 = vst [vmem:[#allocation8 + $0x128] sm:$0xff] %v943_v48  ;;  %v910_v53 = vmax.f32 %v846_v49, 0.0  ;;  %v942_v54 = vmax.f32 %v878_v50, 0.0  ;;  %v849_v55 = vadd.f32 %v1176_v51, %v1404_v16  ;;  %v881_v56 = vadd.f32 %v1224_v52, %v1404_v16 }
 0x10c   :  { %v351_v57 = vpop.f32.mrf.mxu0  ;;  %v511_v58 = vpop.f32.mrf.mxu1 }
 0x10d   :  { %974 = vst [vmem:[#allocation8 + $0x20] sm:$0xff] %v910_v53  ;;  %1006 = vst [vmem:[#allocation8 + $0x120] sm:$0xff] %v942_v54  ;;  %v913_v59 = vmax.f32 %v849_v55, 0.0  ;;  %v945_v60 = vmax.f32 %v881_v56, 0.0  ;;  %v848_v61 = vadd.f32 %v1404_v16, %v351_v57  ;;  %v880_v62 = vadd.f32 %v1404_v16, %v511_v58 }
 0x10e   :  { %v1179_v63 = vpop.f32.mrf.mxu0  ;;  %v1227_v0 = vpop.f32.mrf.mxu1 }
 0x10f   :  { %977 = vst [vmem:[#allocation8 + $0x38] sm:$0xff] %v913_v59  ;;  %1009 = vst [vmem:[#allocation8 + $0x138] sm:$0xff] %v945_v60  ;;  %v912_v1 = vmax.f32 %v848_v61, 0.0  ;;  %v944_v2 = vmax.f32 %v880_v62, 0.0  ;;  %v851_v3 = vadd.f32 %v1179_v63, %v1404_v16  ;;  %v883_v4 = vadd.f32 %v1227_v0, %v1404_v16 }
 0x110   :  { %v361_v5 = vpop.f32.mrf.mxu0  ;;  %v521_v6 = vpop.f32.mrf.mxu1 }
 0x111   :  { %976 = vst [vmem:[#allocation8 + $0x30] sm:$0xff] %v912_v1  ;;  %1008 = vst [vmem:[#allocation8 + $0x130] sm:$0xff] %v944_v2  ;;  %v915_v7 = vmax.f32 %v851_v3, 0.0  ;;  %v947_v8 = vmax.f32 %v883_v4, 0.0  ;;  %v850_v9 = vadd.f32 %v1404_v16, %v361_v5  ;;  %v882_v10 = vadd.f32 %v1404_v16, %v521_v6 }
 0x112   :  { %v1182_v11 = vpop.f32.mrf.mxu0  ;;  %v1230_v12 = vpop.f32.mrf.mxu1 }
 0x113   :  { %979 = vst [vmem:[#allocation8 + $0x48] sm:$0xff] %v915_v7  ;;  %1011 = vst [vmem:[#allocation8 + $0x148] sm:$0xff] %v947_v8  ;;  %v914_v13 = vmax.f32 %v850_v9, 0.0  ;;  %v946_v14 = vmax.f32 %v882_v10, 0.0  ;;  %v853_v15 = vadd.f32 %v1182_v11, %v1404_v16  ;;  %v885_v17 = vadd.f32 %v1230_v12, %v1404_v16 }
 0x114   :  { %v371_v18 = vpop.f32.mrf.mxu0  ;;  %v531_v19 = vpop.f32.mrf.mxu1 }
 0x115   :  { %978 = vst [vmem:[#allocation8 + $0x40] sm:$0xff] %v914_v13  ;;  %1010 = vst [vmem:[#allocation8 + $0x140] sm:$0xff] %v946_v14  ;;  %v917_v20 = vmax.f32 %v853_v15, 0.0  ;;  %v949_v21 = vmax.f32 %v885_v17, 0.0  ;;  %v852_v22 = vadd.f32 %v1404_v16, %v371_v18  ;;  %v884_v23 = vadd.f32 %v1404_v16, %v531_v19 }
 0x116   :  { %v1185_v24 = vpop.f32.mrf.mxu0  ;;  %v1233_v25 = vpop.f32.mrf.mxu1 }
 0x117   :  { %981 = vst [vmem:[#allocation8 + $0x58] sm:$0xff] %v917_v20  ;;  %1013 = vst [vmem:[#allocation8 + $0x158] sm:$0xff] %v949_v21  ;;  %v916_v26 = vmax.f32 %v852_v22, 0.0  ;;  %v948_v27 = vmax.f32 %v884_v23, 0.0  ;;  %v855_v28 = vadd.f32 %v1185_v24, %v1404_v16  ;;  %v887_v29 = vadd.f32 %v1233_v25, %v1404_v16 }
 0x118   :  { %v381_v30 = vpop.f32.mrf.mxu0  ;;  %v541_v31 = vpop.f32.mrf.mxu1 }
 0x119   :  { %980 = vst [vmem:[#allocation8 + $0x50] sm:$0xff] %v916_v26  ;;  %1012 = vst [vmem:[#allocation8 + $0x150] sm:$0xff] %v948_v27  ;;  %v919_v32 = vmax.f32 %v855_v28, 0.0  ;;  %v951_v33 = vmax.f32 %v887_v29, 0.0  ;;  %v854_v34 = vadd.f32 %v1404_v16, %v381_v30  ;;  %v886_v35 = vadd.f32 %v1404_v16, %v541_v31 }
 0x11a   :  { %v1188_v36 = vpop.f32.mrf.mxu0  ;;  %v1236_v37 = vpop.f32.mrf.mxu1 }
 0x11b   :  { %983 = vst [vmem:[#allocation8 + $0x68] sm:$0xff] %v919_v32  ;;  %1015 = vst [vmem:[#allocation8 + $0x168] sm:$0xff] %v951_v33  ;;  %v918_v38 = vmax.f32 %v854_v34, 0.0  ;;  %v950_v39 = vmax.f32 %v886_v35, 0.0  ;;  %v857_v40 = vadd.f32 %v1188_v36, %v1404_v16  ;;  %v889_v41 = vadd.f32 %v1236_v37, %v1404_v16 }
 0x11c   :  { %v391_v42 = vpop.f32.mrf.mxu0  ;;  %v551_v43 = vpop.f32.mrf.mxu1 }
 0x11d   :  { %982 = vst [vmem:[#allocation8 + $0x60] sm:$0xff] %v918_v38  ;;  %1014 = vst [vmem:[#allocation8 + $0x160] sm:$0xff] %v950_v39  ;;  %v921_v44 = vmax.f32 %v857_v40, 0.0  ;;  %v953_v45 = vmax.f32 %v889_v41, 0.0  ;;  %v856_v46 = vadd.f32 %v1404_v16, %v391_v42  ;;  %v888_v47 = vadd.f32 %v1404_v16, %v551_v43 }
 0x11e   :  { %v1191_v48 = vpop.f32.mrf.mxu0  ;;  %v1239_v49 = vpop.f32.mrf.mxu1 }
 0x11f   :  { %985 = vst [vmem:[#allocation8 + $0x78] sm:$0xff] %v921_v44  ;;  %1017 = vst [vmem:[#allocation8 + $0x178] sm:$0xff] %v953_v45  ;;  %v920_v50 = vmax.f32 %v856_v46, 0.0  ;;  %v952_v51 = vmax.f32 %v888_v47, 0.0  ;;  %v859_v52 = vadd.f32 %v1191_v48, %v1404_v16  ;;  %v891_v53 = vadd.f32 %v1239_v49, %v1404_v16 }
 0x120   :  { %v401_v54 = vpop.f32.mrf.mxu0  ;;  %v561_v55 = vpop.f32.mrf.mxu1 }
 0x121   :  { %984 = vst [vmem:[#allocation8 + $0x70] sm:$0xff] %v920_v50  ;;  %1016 = vst [vmem:[#allocation8 + $0x170] sm:$0xff] %v952_v51  ;;  %v923_v56 = vmax.f32 %v859_v52, 0.0  ;;  %v955_v57 = vmax.f32 %v891_v53, 0.0  ;;  %v858_v58 = vadd.f32 %v1404_v16, %v401_v54  ;;  %v890_v59 = vadd.f32 %v1404_v16, %v561_v55 }
 0x122   :  { %v1194_v60 = vpop.f32.mrf.mxu0  ;;  %v1242_v61 = vpop.f32.mrf.mxu1 }
 0x123   :  { %987 = vst [vmem:[#allocation8 + $0x88] sm:$0xff] %v923_v56  ;;  %1019 = vst [vmem:[#allocation8 + $0x188] sm:$0xff] %v955_v57  ;;  %v922_v62 = vmax.f32 %v858_v58, 0.0  ;;  %v954_v63 = vmax.f32 %v890_v59, 0.0  ;;  %v861_v0 = vadd.f32 %v1194_v60, %v1404_v16  ;;  %v893_v1 = vadd.f32 %v1242_v61, %v1404_v16 }
 0x124   :  { %v411_v2 = vpop.f32.mrf.mxu0  ;;  %v571_v3 = vpop.f32.mrf.mxu1 }
 0x125   :  { %986 = vst [vmem:[#allocation8 + $0x80] sm:$0xff] %v922_v62  ;;  %1018 = vst [vmem:[#allocation8 + $0x180] sm:$0xff] %v954_v63  ;;  %v925_v4 = vmax.f32 %v861_v0, 0.0  ;;  %v957_v5 = vmax.f32 %v893_v1, 0.0  ;;  %v860_v6 = vadd.f32 %v1404_v16, %v411_v2  ;;  %v892_v7 = vadd.f32 %v1404_v16, %v571_v3 }
 0x126   :  { %v1197_v8 = vpop.f32.mrf.mxu0  ;;  %v1245_v9 = vpop.f32.mrf.mxu1 }
 0x127   :  { %989 = vst [vmem:[#allocation8 + $0x98] sm:$0xff] %v925_v4  ;;  %1021 = vst [vmem:[#allocation8 + $0x198] sm:$0xff] %v957_v5  ;;  %v924_v10 = vmax.f32 %v860_v6, 0.0  ;;  %v956_v11 = vmax.f32 %v892_v7, 0.0  ;;  %v863_v12 = vadd.f32 %v1197_v8, %v1404_v16  ;;  %v895_v13 = vadd.f32 %v1245_v9, %v1404_v16 }
 0x128   :  { %v421_v14 = vpop.f32.mrf.mxu0  ;;  %v581_v15 = vpop.f32.mrf.mxu1 }
 0x129   :  { %988 = vst [vmem:[#allocation8 + $0x90] sm:$0xff] %v924_v10  ;;  %1020 = vst [vmem:[#allocation8 + $0x190] sm:$0xff] %v956_v11  ;;  %v927_v17 = vmax.f32 %v863_v12, 0.0  ;;  %v959_v18 = vmax.f32 %v895_v13, 0.0  ;;  %v862_v19 = vadd.f32 %v1404_v16, %v421_v14  ;;  %v894_v20 = vadd.f32 %v1404_v16, %v581_v15 }
 0x12a   :  { %v1200_v21 = vpop.f32.mrf.mxu0  ;;  %v1248_v22 = vpop.f32.mrf.mxu1 }
 0x12b   :  { %991 = vst [vmem:[#allocation8 + $0xa8] sm:$0xff] %v927_v17  ;;  %1023 = vst [vmem:[#allocation8 + $0x1a8] sm:$0xff] %v959_v18  ;;  %v926_v23 = vmax.f32 %v862_v19, 0.0  ;;  %v958_v24 = vmax.f32 %v894_v20, 0.0  ;;  %v865_v25 = vadd.f32 %v1200_v21, %v1404_v16  ;;  %v897_v26 = vadd.f32 %v1248_v22, %v1404_v16 }
 0x12c   :  { %v431_v27 = vpop.f32.mrf.mxu0  ;;  %v591_v28 = vpop.f32.mrf.mxu1 }
 0x12d   :  { %990 = vst [vmem:[#allocation8 + $0xa0] sm:$0xff] %v926_v23  ;;  %1022 = vst [vmem:[#allocation8 + $0x1a0] sm:$0xff] %v958_v24  ;;  %v929_v29 = vmax.f32 %v865_v25, 0.0  ;;  %v961_v30 = vmax.f32 %v897_v26, 0.0  ;;  %v864_v31 = vadd.f32 %v1404_v16, %v431_v27  ;;  %v896_v32 = vadd.f32 %v1404_v16, %v591_v28 }
 0x12e   :  { %v1203_v33 = vpop.f32.mrf.mxu0  ;;  %v1251_v34 = vpop.f32.mrf.mxu1 }
 0x12f   :  { %993 = vst [vmem:[#allocation8 + $0xb8] sm:$0xff] %v929_v29  ;;  %1025 = vst [vmem:[#allocation8 + $0x1b8] sm:$0xff] %v961_v30  ;;  %v928_v35 = vmax.f32 %v864_v31, 0.0  ;;  %v960_v36 = vmax.f32 %v896_v32, 0.0  ;;  %v867_v37 = vadd.f32 %v1203_v33, %v1404_v16  ;;  %v899_v38 = vadd.f32 %v1251_v34, %v1404_v16 }
 0x130   :  { %v441_v39 = vpop.f32.mrf.mxu0  ;;  %v601_v40 = vpop.f32.mrf.mxu1 }
 0x131   :  { %992 = vst [vmem:[#allocation8 + $0xb0] sm:$0xff] %v928_v35  ;;  %1024 = vst [vmem:[#allocation8 + $0x1b0] sm:$0xff] %v960_v36  ;;  %v931_v41 = vmax.f32 %v867_v37, 0.0  ;;  %v963_v42 = vmax.f32 %v899_v38, 0.0  ;;  %v866_v43 = vadd.f32 %v1404_v16, %v441_v39  ;;  %v898_v44 = vadd.f32 %v1404_v16, %v601_v40 }
 0x132   :  { %v1206_v45 = vpop.f32.mrf.mxu0  ;;  %v1254_v46 = vpop.f32.mrf.mxu1 }
 0x133   :  { %995 = vst [vmem:[#allocation8 + $0xc8] sm:$0xff] %v931_v41  ;;  %1027 = vst [vmem:[#allocation8 + $0x1c8] sm:$0xff] %v963_v42  ;;  %v930_v47 = vmax.f32 %v866_v43, 0.0  ;;  %v962_v48 = vmax.f32 %v898_v44, 0.0  ;;  %v869_v49 = vadd.f32 %v1206_v45, %v1404_v16  ;;  %v901_v50 = vadd.f32 %v1254_v46, %v1404_v16 }
 0x134   :  { %v451_v51 = vpop.f32.mrf.mxu0  ;;  %v611_v52 = vpop.f32.mrf.mxu1 }
 0x135   :  { %994 = vst [vmem:[#allocation8 + $0xc0] sm:$0xff] %v930_v47  ;;  %1026 = vst [vmem:[#allocation8 + $0x1c0] sm:$0xff] %v962_v48  ;;  %v933_v53 = vmax.f32 %v869_v49, 0.0  ;;  %v965_v54 = vmax.f32 %v901_v50, 0.0  ;;  %v868_v55 = vadd.f32 %v1404_v16, %v451_v51  ;;  %v900_v56 = vadd.f32 %v1404_v16, %v611_v52 }
 0x136   :  { %v1209_v57 = vpop.f32.mrf.mxu0  ;;  %v1257_v58 = vpop.f32.mrf.mxu1 }
 0x137   :  { %997 = vst [vmem:[#allocation8 + $0xd8] sm:$0xff] %v933_v53  ;;  %1029 = vst [vmem:[#allocation8 + $0x1d8] sm:$0xff] %v965_v54  ;;  %v932_v59 = vmax.f32 %v868_v55, 0.0  ;;  %v964_v60 = vmax.f32 %v900_v56, 0.0  ;;  %v871_v61 = vadd.f32 %v1209_v57, %v1404_v16  ;;  %v903_v62 = vadd.f32 %v1257_v58, %v1404_v16 }
 0x138   :  { %v461_v63 = vpop.f32.mrf.mxu0  ;;  %v621_v0 = vpop.f32.mrf.mxu1 }
 0x139   :  { %996 = vst [vmem:[#allocation8 + $0xd0] sm:$0xff] %v932_v59  ;;  %1028 = vst [vmem:[#allocation8 + $0x1d0] sm:$0xff] %v964_v60  ;;  %v935_v1 = vmax.f32 %v871_v61, 0.0  ;;  %v967_v2 = vmax.f32 %v903_v62, 0.0  ;;  %v870_v3 = vadd.f32 %v1404_v16, %v461_v63  ;;  %v902_v4 = vadd.f32 %v1404_v16, %v621_v0 }
 0x13a   :  { %v1212_v5 = vpop.f32.mrf.mxu0  ;;  %v1260_v6 = vpop.f32.mrf.mxu1 }
 0x13b   :  { %999 = vst [vmem:[#allocation8 + $0xe8] sm:$0xff] %v935_v1  ;;  %1031 = vst [vmem:[#allocation8 + $0x1e8] sm:$0xff] %v967_v2  ;;  %v934_v7 = vmax.f32 %v870_v3, 0.0  ;;  %v966_v8 = vmax.f32 %v902_v4, 0.0  ;;  %v873_v9 = vadd.f32 %v1212_v5, %v1404_v16  ;;  %v905_v10 = vadd.f32 %v1260_v6, %v1404_v16 }
 0x13c   :  { %v471_v11 = vpop.f32.mrf.mxu0  ;;  %v631_v12 = vpop.f32.mrf.mxu1 }
 0x13d   :  { %998 = vst [vmem:[#allocation8 + $0xe0] sm:$0xff] %v934_v7  ;;  %1030 = vst [vmem:[#allocation8 + $0x1e0] sm:$0xff] %v966_v8  ;;  %v937_v13 = vmax.f32 %v873_v9, 0.0  ;;  %v969_v14 = vmax.f32 %v905_v10, 0.0  ;;  %v872_v15 = vadd.f32 %v1404_v16, %v471_v11  ;;  %v904_v17 = vadd.f32 %v1404_v16, %v631_v12 }
 0x13f   :  { %1001 = vst [vmem:[#allocation8 + $0xf8] sm:$0xff] %v937_v13  ;;  %1033 = vst [vmem:[#allocation8 + $0x1f8] sm:$0xff] %v969_v14  ;;  %v936_v18 = vmax.f32 %v872_v15, 0.0  ;;  %v968_v19 = vmax.f32 %v904_v17, 0.0 }
 0x141   :  { %1000 = vst [vmem:[#allocation8 + $0xf0] sm:$0xff] %v936_v18  ;;  %1032 = vst [vmem:[#allocation8 + $0x1f0] sm:$0xff] %v968_v19 }
 0x142   :  { %1349 = shalt.err (!%p1346_p0)
}
 0x143   :  { %1045 = dma.vmem_to_hbm [thread:$0]  %s1040_s24, 8192, %s1479_s3, [#allocation5], %s1365_s15, %s1365_s15, %s1366_s16  }
 0x144   :  { %1362 = dma.done.wait [#allocation5], 8192  }
 0x145   :  { %1363 = vsyncadd [#allocation5], 4294959104 }
 0x146   :  { %1049 = vsyncpa [#allocation4], 1 }
 0x147   :  { %1050 = vsyncpa [#allocation7], 1 }
 0x148   :  { %1051 = vsyncpa [#allocation5], 1 }

</bundles_post_ra>
